<compile_context>
chip_gen: v5e
topology: v5e:2x2
jax: 0.10.0
libtpu: 0.0.40
codegen_flags: <defaults>
</compile_context>

<pallas_src>
import numpy as np
import jax
import jax.numpy as jnp
from jax.experimental import pallas as pl
from jax.experimental.pallas import tpu as pltpu

LANE = 128


def _round_up(x, k):
    return ((x + k - 1) // k) * k


# ----------------------------------------------------------------------------
# Deterministic "parameters": the Gell-Mann basis of su(n) (module buffers).
# ----------------------------------------------------------------------------
def gell_mann_su_n(n):
    gens = []
    for j in range(n):
        for k in range(j + 1, n):
            m = np.zeros((n, n), dtype=np.complex64)
            m[j, k] = m[k, j] = 1.0
            gens.append(m)
    for j in range(n):
        for k in range(j + 1, n):
            m = np.zeros((n, n), dtype=np.complex64)
            m[j, k] = -1j
            m[k, j] = 1j
            gens.append(m)
    for l in range(1, n):
        m = np.zeros((n, n), dtype=np.complex64)
        for i in range(l):
            m[i, i] = 1.0
        m[l, l] = -l
        m /= np.sqrt(np.float32(l * (l + 1)))
        gens.append(m)
    return np.stack(gens, axis=0)  # (n*n - 1, n, n) complex64


def build_projection(n):
    """Transposed projection P^T of shape (m_pad, 2*n*n), m padded to a
    multiple of 8 (sublanes) only -- no 128-lane padding of the output.
    Column layout matches the kernel's f^T rows:
      col i*2n + j     ->  Re(G_k[j, i])
      col i*2n + n + j -> -Im(G_k[j, i])
    so  theta^T = P^T @ f^T  with f^T rows [ReH[i,0..n-1]; ImH[i,0..n-1]]
    per i-block of 2n rows (8-sublane aligned blocks)."""
    gens = gell_mann_su_n(n)                              # (m, n, n) complex64
    m = gens.shape[0]
    nn = n * n
    m_pad = _round_up(m, 8)
    p_re = gens.real.transpose(0, 2, 1)                   # [k, i, j] =  Re G_k[j, i]
    p_im = -gens.imag.transpose(0, 2, 1)                  # [k, i, j] = -Im G_k[j, i]
    p_full = np.concatenate([p_re, p_im], axis=2).reshape(m, 2 * nn)
    p_t = np.zeros((m_pad, 2 * nn), np.float32)
    p_t[:m, :] = p_full.astype(np.float32)
    return p_t, gens, m


# ----------------------------------------------------------------------------
# Host-side eigen preprocessing (mirrors the torch forward up to eigh(H)) and
# the batch-on-lanes layout transposes.
# ----------------------------------------------------------------------------
def preprocess(u):
    # TODO(synk): torch.linalg.{det,eig,inv,eigh} (general complex eigendecomp /
    # matrix log) have no Pallas/TPU kernel equivalent (jnp.linalg.eig is
    # CPU-only), so this stage stays on the host as batched numpy linalg.
    # Note: det**(1/n) uses the principal root; a different n-th root only
    # shifts all eigenphases by a constant, which cancels under the
    # traceless-generator projection.
    u = np.asarray(u, dtype=np.complex64)
    bsz, n, _ = u.shape
    det = np.linalg.det(u)                                   # (B,)
    u_su = (u / (det ** (1.0 / n))[:, None, None]).astype(np.complex64)
    w, v = np.linalg.eig(u_su)                               # (B,n), (B,n,n)
    v_inv = np.linalg.inv(v)
    log_u = v @ (np.log(w)[..., None] * v_inv)               # V diag(log w) V^{-1}
    h = (-1j) * log_u
    evals, evecs = np.linalg.eigh(h)
    # Batch-on-lanes layouts, built on the host (no device-side transposes).
    lam_t = np.ascontiguousarray(np.real(evals).astype(np.float32).T)   # (n, B)
    vre_t = np.ascontiguousarray(
        evecs.real.astype(np.float32).transpose(2, 1, 0).reshape(n * n, bsz))
    vim_t = np.ascontiguousarray(
        evecs.imag.astype(np.float32).transpose(2, 1, 0).reshape(n * n, bsz))
    return lam_t, vre_t, vim_t


# ----------------------------------------------------------------------------
# Pallas kernel: wrap eigenphases, rebuild H_unique = V diag(c) V^H with
# lane-dense VPU slabs (batch on lanes), project onto all Gell-Mann generators
# with one fused MXU matmul.  TB batch elements per grid step (on lanes).
# ----------------------------------------------------------------------------
def _gell_mann_kernel(lam_ref, vre_ref, vim_ref, pt_ref, out_ref, f_ref):
    n, tb = lam_ref.shape                                # (n, TB)
    nn = n * n
    two_pi = jnp.float32(2.0 * np.pi)
    inv_two_pi = jnp.float32(1.0 / (2.0 * np.pi))

    # torch.remainder(eigvals, 2*pi).  Mean-centering is dropped on purpose:
    # subtracting mean(w)*I from H adds mean(w)*tr(G_k) = 0 to every theta_k
    # (Gell-Mann generators are traceless, V is unitary), so theta is unchanged.
    lam = lam_ref[...]                                   # (n, TB), batch on lanes
    c = lam - two_pi * jnp.floor(lam * inv_two_pi)       # (n, TB)

    vre = vre_ref[...]                                   # (nn, TB): row p*n+i = Re V[i,p]
    vim = vim_ref[...]

    # H_unique[b,i,j] = sum_p c_p V[i,p] conj(V[j,p]).  Build f^T (2*nn, TB)
    # directly into the matmul-ready scratch; per i-block of 2n rows:
    #   rows i*2n + j     = Re H[i, j]
    #   rows i*2n + n + j = Im H[i, j]
    # All VPU work is on lane-dense (n, TB) slabs (static unroll, n tiny).
    for i in range(n):
        re_acc = jnp.zeros((n, tb), jnp.float32)
        im_acc = jnp.zeros((n, tb), jnp.float32)
        for p in range(n):
            ar = vre[p * n:(p + 1) * n, :]               # (n, TB): Re V[j, p]
            ai = vim[p * n:(p + 1) * n, :]               # (n, TB): Im V[j, p]
            cp = c[p:p + 1, :]                           # (1, TB)
            xr = cp * vre[p * n + i:p * n + i + 1, :]    # c_p Re V[i, p]
            xi = cp * vim[p * n + i:p * n + i + 1, :]    # c_p Im V[i, p]
            re_acc = re_acc + xr * ar + xi * ai          # Re H[i, j=0..n-1]
            im_acc = im_acc + xi * ar - xr * ai          # Im H[i, j=0..n-1]
        f_ref[i * 2 * n:i * 2 * n + n, :] = re_acc
        f_ref[i * 2 * n + n:(i + 1) * 2 * n, :] = im_acc

    # theta^T = P^T (m_pad, 2*nn) @ f^T (2*nn, TB): one MXU matmul, N=TB large.
    out_ref[...] = jnp.dot(pt_ref[...], f_ref[...],
                           preferred_element_type=jnp.float32)


def gell_mann_embedding(lam_t, vre_t, vim_t, p_t, m, *, tb=2048):
    """lam_t: (n, B) f32; vre_t/vim_t: (n*n, B) f32 (row p*n+i = V[i,p]);
       p_t: (m_pad, 2*n*n) f32 transposed projection; returns theta (B, m) f32."""
    lam_t = np.asarray(lam_t, np.float32)
    vre_t = np.asarray(vre_t, np.float32)
    vim_t = np.asarray(vim_t, np.float32)
    p_t = np.asarray(p_t, np.float32)
    n, bsz = lam_t.shape
    nn = n * n
    m_pad = p_t.shape[0]

    # Batch rides the lane axis -> tile must be a multiple of 128 lanes.
    tb = max(LANE, _round_up(min(tb, _round_up(bsz, LANE)), LANE))
    # Keep >= 2 grid steps whenever there is enough batch to split, so the
    # "parallel" batch axis actually feeds both TensorCores on v7x.
    if bsz > LANE:
        tb = min(tb, _round_up((bsz + 1) // 2, LANE))
    b_pad = _round_up(bsz, tb)

    # Pad on the host (padded columns have lam=0 -> theta column 0, sliced off).
    if b_pad != bsz:
        pad = ((0, 0), (0, b_pad - bsz))
        lam_t = np.pad(lam_t, pad)
        vre_t = np.pad(vre_t, pad)
        vim_t = np.pad(vim_t, pad)

    out = pl.pallas_call(
        _gell_mann_kernel,
        out_shape=jax.ShapeDtypeStruct((m_pad, b_pad), jnp.float32),
        grid_spec=pltpu.PrefetchScalarGridSpec(
            num_scalar_prefetch=0,
            grid=(b_pad // tb,),
            in_specs=[
                pl.BlockSpec((n, tb), lambda b: (0, b)),
                pl.BlockSpec((nn, tb), lambda b: (0, b)),
                pl.BlockSpec((nn, tb), lambda b: (0, b)),
                # Grid-invariant projection matrix (2 KiB at n=4).
                pl.BlockSpec((m_pad, 2 * nn), lambda b: (0, 0)),
            ],
            out_specs=pl.BlockSpec((m_pad, tb), lambda b: (0, b)),
            scratch_shapes=[pltpu.VMEM((2 * nn, tb), jnp.float32)],
        ),
        compiler_params=pltpu.CompilerParams(
            # Batch axis is fully independent -> shard across both TCs on v7x;
            # no-op on v5e/v6e (1 TC).
            dimension_semantics=("parallel",),
            # Footprint at tb=2048 is ~1 MiB double-buffered; explicit limit
            # overrides v5e's 16 MiB default while leaving headroom on v7x.
            vmem_limit_bytes=32 * 1024 * 1024,
        ),
    )(jnp.asarray(lam_t), jnp.asarray(vre_t), jnp.asarray(vim_t),
      jnp.asarray(p_t))
    return jnp.transpose(out[:m, :bsz])                  # (B, m)


# ----------------------------------------------------------------------------
if __name__ == "__main__":
    B, n = 2, 4
    p_t, gens, m = build_projection(n)                   # m = n*n - 1 = 15

    # Deterministic random unitary inputs (the module operates on unitaries).
    key = jax.random.PRNGKey(0)
    kr, ki = jax.random.split(key)
    z = (np.asarray(jax.random.normal(kr, (B, n, n), jnp.float32))
         + 1j * np.asarray(jax.random.normal(ki, (B, n, n), jnp.float32)))
    U = np.stack([np.linalg.qr(z[b].astype(np.complex64))[0] for b in range(B)])
    U = U.astype(np.complex64)

    # Host eigen preprocessing (det / logm-by-eig / eigh), as in torch forward.
    lam_t, vre_t, vim_t = preprocess(U)

    theta = gell_mann_embedding(lam_t, vre_t, vim_t, p_t, m)
    theta = jax.block_until_ready(theta)
    assert theta.shape == (B, m)

    # Pure numpy reference of the same hot path (wrap / center / V diag(c) V^H /
    # generator projection); keeps the original mean-centering, which guards
    # the in-kernel "drop centering" refactor (traceless generators).
    ref = np.zeros((B, m), np.float32)
    for b in range(B):
        wb = np.mod(lam_t[:, b].astype(np.float64), 2.0 * np.pi)
        cb = wb - wb.mean()
        V = (vre_t[:, b] + 1j * vim_t[:, b]).reshape(n, n).T.astype(np.complex128)
        Hu = V @ np.diag(cb) @ V.conj().T
        for k in range(m):
            ref[b, k] = np.real(np.trace(Hu @ gens[k].astype(np.complex128)))
    np.testing.assert_allclose(np.asarray(theta), ref, rtol=1e-4, atol=1e-4)

    print("KERNEL_OK")
</pallas_src>

<mosaic_0001>
module attributes {stable_mosaic.version = 11 : i64} {
  func.func @_gell_mann_kernel(%arg0: i32, %arg1: memref<4x128xf32, #tpu.memory_space<vmem>>, %arg2: memref<16x128xf32, #tpu.memory_space<vmem>>, %arg3: memref<16x128xf32, #tpu.memory_space<vmem>>, %arg4: memref<16x32xf32, #tpu.memory_space<vmem>>, %arg5: memref<16x128xf32, #tpu.memory_space<vmem>>, %arg6: memref<32x128xf32, #tpu.memory_space<vmem>>) attributes {dimension_semantics = [#tpu.dimension_semantics<parallel>], iteration_bounds = array<i64: 1>, scalar_prefetch = 0 : i64, scratch_operands = 1 : i64, tpu.core_type = #tpu.core_type<tc>, window_params = [{transform_indices = @transform_0, window_bounds = array<i64: 4, 128>}, {transform_indices = @transform_1, window_bounds = array<i64: 16, 128>}, {transform_indices = @transform_2, window_bounds = array<i64: 16, 128>}, {pipeline_mode = #tpu.pipeline_mode<synchronous>, transform_indices = @transform_3, window_bounds = array<i64: 16, 32>}, {transform_indices = @transform_4, window_bounds = array<i64: 16, 128>}]} {
    %c0 = arith.constant 0 : index
    %c0_0 = arith.constant 0 : index
    %0 = vector.load %arg1[%c0, %c0_0] : memref<4x128xf32, #tpu.memory_space<vmem>>, vector<4x128xf32>
    %cst = arith.constant 0.159154937 : f32
    %1 = vector.broadcast %cst : f32 to vector<4x128xf32>
    %2 = arith.mulf %0, %1 : vector<4x128xf32>
    %3 = math.floor %2 : vector<4x128xf32>
    %cst_1 = arith.constant 6.28318548 : f32
    %4 = vector.broadcast %cst_1 : f32 to vector<4x128xf32>
    %5 = arith.mulf %4, %3 : vector<4x128xf32>
    %6 = arith.subf %0, %5 : vector<4x128xf32>
    %c0_2 = arith.constant 0 : index
    %c0_3 = arith.constant 0 : index
    %7 = vector.load %arg2[%c0_2, %c0_3] : memref<16x128xf32, #tpu.memory_space<vmem>>, vector<16x128xf32>
    %c0_4 = arith.constant 0 : index
    %c0_5 = arith.constant 0 : index
    %8 = vector.load %arg3[%c0_4, %c0_5] : memref<16x128xf32, #tpu.memory_space<vmem>>, vector<16x128xf32>
    %cst_6 = arith.constant 0.000000e+00 : f32
    %9 = vector.broadcast %cst_6 : f32 to vector<4x128xf32>
    %cst_7 = arith.constant 0.000000e+00 : f32
    %10 = vector.broadcast %cst_7 : f32 to vector<4x128xf32>
    %11 = vector.extract_strided_slice %7 {offsets = [0, 0], sizes = [4, 128], strides = [1, 1]} : vector<16x128xf32> to vector<4x128xf32>
    %12 = vector.extract_strided_slice %8 {offsets = [0, 0], sizes = [4, 128], strides = [1, 1]} : vector<16x128xf32> to vector<4x128xf32>
    %13 = vector.extract_strided_slice %6 {offsets = [0, 0], sizes = [1, 128], strides = [1, 1]} : vector<4x128xf32> to vector<1x128xf32>
    %14 = vector.extract_strided_slice %7 {offsets = [0, 0], sizes = [1, 128], strides = [1, 1]} : vector<16x128xf32> to vector<1x128xf32>
    %15 = arith.mulf %13, %14 : vector<1x128xf32>
    %16 = vector.extract_strided_slice %8 {offsets = [0, 0], sizes = [1, 128], strides = [1, 1]} : vector<16x128xf32> to vector<1x128xf32>
    %17 = arith.mulf %13, %16 : vector<1x128xf32>
    %18 = vector.broadcast %15 : vector<1x128xf32> to vector<4x128xf32>
    %19 = arith.mulf %18, %11 : vector<4x128xf32>
    %20 = arith.addf %9, %19 : vector<4x128xf32>
    %21 = vector.broadcast %17 : vector<1x128xf32> to vector<4x128xf32>
    %22 = arith.mulf %21, %12 : vector<4x128xf32>
    %23 = arith.addf %20, %22 : vector<4x128xf32>
    %24 = vector.broadcast %17 : vector<1x128xf32> to vector<4x128xf32>
    %25 = arith.mulf %24, %11 : vector<4x128xf32>
    %26 = arith.addf %10, %25 : vector<4x128xf32>
    %27 = vector.broadcast %15 : vector<1x128xf32> to vector<4x128xf32>
    %28 = arith.mulf %27, %12 : vector<4x128xf32>
    %29 = arith.subf %26, %28 : vector<4x128xf32>
    %30 = vector.extract_strided_slice %7 {offsets = [4, 0], sizes = [4, 128], strides = [1, 1]} : vector<16x128xf32> to vector<4x128xf32>
    %31 = vector.extract_strided_slice %8 {offsets = [4, 0], sizes = [4, 128], strides = [1, 1]} : vector<16x128xf32> to vector<4x128xf32>
    %32 = vector.extract_strided_slice %6 {offsets = [1, 0], sizes = [1, 128], strides = [1, 1]} : vector<4x128xf32> to vector<1x128xf32>
    %33 = vector.extract_strided_slice %7 {offsets = [4, 0], sizes = [1, 128], strides = [1, 1]} : vector<16x128xf32> to vector<1x128xf32>
    %34 = arith.mulf %32, %33 : vector<1x128xf32>
    %35 = vector.extract_strided_slice %8 {offsets = [4, 0], sizes = [1, 128], strides = [1, 1]} : vector<16x128xf32> to vector<1x128xf32>
    %36 = arith.mulf %32, %35 : vector<1x128xf32>
    %37 = vector.broadcast %34 : vector<1x128xf32> to vector<4x128xf32>
    %38 = arith.mulf %37, %30 : vector<4x128xf32>
    %39 = arith.addf %23, %38 : vector<4x128xf32>
    %40 = vector.broadcast %36 : vector<1x128xf32> to vector<4x128xf32>
    %41 = arith.mulf %40, %31 : vector<4x128xf32>
    %42 = arith.addf %39, %41 : vector<4x128xf32>
    %43 = vector.broadcast %36 : vector<1x128xf32> to vector<4x128xf32>
    %44 = arith.mulf %43, %30 : vector<4x128xf32>
    %45 = arith.addf %29, %44 : vector<4x128xf32>
    %46 = vector.broadcast %34 : vector<1x128xf32> to vector<4x128xf32>
    %47 = arith.mulf %46, %31 : vector<4x128xf32>
    %48 = arith.subf %45, %47 : vector<4x128xf32>
    %49 = vector.extract_strided_slice %7 {offsets = [8, 0], sizes = [4, 128], strides = [1, 1]} : vector<16x128xf32> to vector<4x128xf32>
    %50 = vector.extract_strided_slice %8 {offsets = [8, 0], sizes = [4, 128], strides = [1, 1]} : vector<16x128xf32> to vector<4x128xf32>
    %51 = vector.extract_strided_slice %6 {offsets = [2, 0], sizes = [1, 128], strides = [1, 1]} : vector<4x128xf32> to vector<1x128xf32>
    %52 = vector.extract_strided_slice %7 {offsets = [8, 0], sizes = [1, 128], strides = [1, 1]} : vector<16x128xf32> to vector<1x128xf32>
    %53 = arith.mulf %51, %52 : vector<1x128xf32>
    %54 = vector.extract_strided_slice %8 {offsets = [8, 0], sizes = [1, 128], strides = [1, 1]} : vector<16x128xf32> to vector<1x128xf32>
    %55 = arith.mulf %51, %54 : vector<1x128xf32>
    %56 = vector.broadcast %53 : vector<1x128xf32> to vector<4x128xf32>
    %57 = arith.mulf %56, %49 : vector<4x128xf32>
    %58 = arith.addf %42, %57 : vector<4x128xf32>
    %59 = vector.broadcast %55 : vector<1x128xf32> to vector<4x128xf32>
    %60 = arith.mulf %59, %50 : vector<4x128xf32>
    %61 = arith.addf %58, %60 : vector<4x128xf32>
    %62 = vector.broadcast %55 : vector<1x128xf32> to vector<4x128xf32>
    %63 = arith.mulf %62, %49 : vector<4x128xf32>
    %64 = arith.addf %48, %63 : vector<4x128xf32>
    %65 = vector.broadcast %53 : vector<1x128xf32> to vector<4x128xf32>
    %66 = arith.mulf %65, %50 : vector<4x128xf32>
    %67 = arith.subf %64, %66 : vector<4x128xf32>
    %68 = vector.extract_strided_slice %7 {offsets = [12, 0], sizes = [4, 128], strides = [1, 1]} : vector<16x128xf32> to vector<4x128xf32>
    %69 = vector.extract_strided_slice %8 {offsets = [12, 0], sizes = [4, 128], strides = [1, 1]} : vector<16x128xf32> to vector<4x128xf32>
    %70 = vector.extract_strided_slice %6 {offsets = [3, 0], sizes = [1, 128], strides = [1, 1]} : vector<4x128xf32> to vector<1x128xf32>
    %71 = vector.extract_strided_slice %7 {offsets = [12, 0], sizes = [1, 128], strides = [1, 1]} : vector<16x128xf32> to vector<1x128xf32>
    %72 = arith.mulf %70, %71 : vector<1x128xf32>
    %73 = vector.extract_strided_slice %8 {offsets = [12, 0], sizes = [1, 128], strides = [1, 1]} : vector<16x128xf32> to vector<1x128xf32>
    %74 = arith.mulf %70, %73 : vector<1x128xf32>
    %75 = vector.broadcast %72 : vector<1x128xf32> to vector<4x128xf32>
    %76 = arith.mulf %75, %68 : vector<4x128xf32>
    %77 = arith.addf %61, %76 : vector<4x128xf32>
    %78 = vector.broadcast %74 : vector<1x128xf32> to vector<4x128xf32>
    %79 = arith.mulf %78, %69 : vector<4x128xf32>
    %80 = arith.addf %77, %79 : vector<4x128xf32>
    %81 = vector.broadcast %74 : vector<1x128xf32> to vector<4x128xf32>
    %82 = arith.mulf %81, %68 : vector<4x128xf32>
    %83 = arith.addf %67, %82 : vector<4x128xf32>
    %84 = vector.broadcast %72 : vector<1x128xf32> to vector<4x128xf32>
    %85 = arith.mulf %84, %69 : vector<4x128xf32>
    %86 = arith.subf %83, %85 : vector<4x128xf32>
    %c0_8 = arith.constant 0 : index
    %c0_9 = arith.constant 0 : index
    %87 = vector.load %arg6[%c0_8, %c0_9] : memref<32x128xf32, #tpu.memory_space<vmem>>, vector<4x128xf32>
    tpu.vector_store %arg6[%c0_8, %c0_9], %80 {strides = array<i32>} : memref<32x128xf32, #tpu.memory_space<vmem>>, vector<4x128xf32>,
    %c4 = arith.constant 4 : index
    %c0_10 = arith.constant 0 : index
    %88 = vector.load %arg6[%c4, %c0_10] : memref<32x128xf32, #tpu.memory_space<vmem>>, vector<4x128xf32>
    tpu.vector_store %arg6[%c4, %c0_10], %86 {strides = array<i32>} : memref<32x128xf32, #tpu.memory_space<vmem>>, vector<4x128xf32>,
    %cst_11 = arith.constant 0.000000e+00 : f32
    %89 = vector.broadcast %cst_11 : f32 to vector<4x128xf32>
    %cst_12 = arith.constant 0.000000e+00 : f32
    %90 = vector.broadcast %cst_12 : f32 to vector<4x128xf32>
    %91 = vector.extract_strided_slice %7 {offsets = [0, 0], sizes = [4, 128], strides = [1, 1]} : vector<16x128xf32> to vector<4x128xf32>
    %92 = vector.extract_strided_slice %8 {offsets = [0, 0], sizes = [4, 128], strides = [1, 1]} : vector<16x128xf32> to vector<4x128xf32>
    %93 = vector.extract_strided_slice %6 {offsets = [0, 0], sizes = [1, 128], strides = [1, 1]} : vector<4x128xf32> to vector<1x128xf32>
    %94 = vector.extract_strided_slice %7 {offsets = [1, 0], sizes = [1, 128], strides = [1, 1]} : vector<16x128xf32> to vector<1x128xf32>
    %95 = arith.mulf %93, %94 : vector<1x128xf32>
    %96 = vector.extract_strided_slice %8 {offsets = [1, 0], sizes = [1, 128], strides = [1, 1]} : vector<16x128xf32> to vector<1x128xf32>
    %97 = arith.mulf %93, %96 : vector<1x128xf32>
    %98 = vector.broadcast %95 : vector<1x128xf32> to vector<4x128xf32>
    %99 = arith.mulf %98, %91 : vector<4x128xf32>
    %100 = arith.addf %89, %99 : vector<4x128xf32>
    %101 = vector.broadcast %97 : vector<1x128xf32> to vector<4x128xf32>
    %102 = arith.mulf %101, %92 : vector<4x128xf32>
    %103 = arith.addf %100, %102 : vector<4x128xf32>
    %104 = vector.broadcast %97 : vector<1x128xf32> to vector<4x128xf32>
    %105 = arith.mulf %104, %91 : vector<4x128xf32>
    %106 = arith.addf %90, %105 : vector<4x128xf32>
    %107 = vector.broadcast %95 : vector<1x128xf32> to vector<4x128xf32>
    %108 = arith.mulf %107, %92 : vector<4x128xf32>
    %109 = arith.subf %106, %108 : vector<4x128xf32>
    %110 = vector.extract_strided_slice %7 {offsets = [4, 0], sizes = [4, 128], strides = [1, 1]} : vector<16x128xf32> to vector<4x128xf32>
    %111 = vector.extract_strided_slice %8 {offsets = [4, 0], sizes = [4, 128], strides = [1, 1]} : vector<16x128xf32> to vector<4x128xf32>
    %112 = vector.extract_strided_slice %6 {offsets = [1, 0], sizes = [1, 128], strides = [1, 1]} : vector<4x128xf32> to vector<1x128xf32>
    %113 = vector.extract_strided_slice %7 {offsets = [5, 0], sizes = [1, 128], strides = [1, 1]} : vector<16x128xf32> to vector<1x128xf32>
    %114 = arith.mulf %112, %113 : vector<1x128xf32>
    %115 = vector.extract_strided_slice %8 {offsets = [5, 0], sizes = [1, 128], strides = [1, 1]} : vector<16x128xf32> to vector<1x128xf32>
    %116 = arith.mulf %112, %115 : vector<1x128xf32>
    %117 = vector.broadcast %114 : vector<1x128xf32> to vector<4x128xf32>
    %118 = arith.mulf %117, %110 : vector<4x128xf32>
    %119 = arith.addf %103, %118 : vector<4x128xf32>
    %120 = vector.broadcast %116 : vector<1x128xf32> to vector<4x128xf32>
    %121 = arith.mulf %120, %111 : vector<4x128xf32>
    %122 = arith.addf %119, %121 : vector<4x128xf32>
    %123 = vector.broadcast %116 : vector<1x128xf32> to vector<4x128xf32>
    %124 = arith.mulf %123, %110 : vector<4x128xf32>
    %125 = arith.addf %109, %124 : vector<4x128xf32>
    %126 = vector.broadcast %114 : vector<1x128xf32> to vector<4x128xf32>
    %127 = arith.mulf %126, %111 : vector<4x128xf32>
    %128 = arith.subf %125, %127 : vector<4x128xf32>
    %129 = vector.extract_strided_slice %7 {offsets = [8, 0], sizes = [4, 128], strides = [1, 1]} : vector<16x128xf32> to vector<4x128xf32>
    %130 = vector.extract_strided_slice %8 {offsets = [8, 0], sizes = [4, 128], strides = [1, 1]} : vector<16x128xf32> to vector<4x128xf32>
    %131 = vector.extract_strided_slice %6 {offsets = [2, 0], sizes = [1, 128], strides = [1, 1]} : vector<4x128xf32> to vector<1x128xf32>
    %132 = vector.extract_strided_slice %7 {offsets = [9, 0], sizes = [1, 128], strides = [1, 1]} : vector<16x128xf32> to vector<1x128xf32>
    %133 = arith.mulf %131, %132 : vector<1x128xf32>
    %134 = vector.extract_strided_slice %8 {offsets = [9, 0], sizes = [1, 128], strides = [1, 1]} : vector<16x128xf32> to vector<1x128xf32>
    %135 = arith.mulf %131, %134 : vector<1x128xf32>
    %136 = vector.broadcast %133 : vector<1x128xf32> to vector<4x128xf32>
    %137 = arith.mulf %136, %129 : vector<4x128xf32>
    %138 = arith.addf %122, %137 : vector<4x128xf32>
    %139 = vector.broadcast %135 : vector<1x128xf32> to vector<4x128xf32>
    %140 = arith.mulf %139, %130 : vector<4x128xf32>
    %141 = arith.addf %138, %140 : vector<4x128xf32>
    %142 = vector.broadcast %135 : vector<1x128xf32> to vector<4x128xf32>
    %143 = arith.mulf %142, %129 : vector<4x128xf32>
    %144 = arith.addf %128, %143 : vector<4x128xf32>
    %145 = vector.broadcast %133 : vector<1x128xf32> to vector<4x128xf32>
    %146 = arith.mulf %145, %130 : vector<4x128xf32>
    %147 = arith.subf %144, %146 : vector<4x128xf32>
    %148 = vector.extract_strided_slice %7 {offsets = [12, 0], sizes = [4, 128], strides = [1, 1]} : vector<16x128xf32> to vector<4x128xf32>
    %149 = vector.extract_strided_slice %8 {offsets = [12, 0], sizes = [4, 128], strides = [1, 1]} : vector<16x128xf32> to vector<4x128xf32>
    %150 = vector.extract_strided_slice %6 {offsets = [3, 0], sizes = [1, 128], strides = [1, 1]} : vector<4x128xf32> to vector<1x128xf32>
    %151 = vector.extract_strided_slice %7 {offsets = [13, 0], sizes = [1, 128], strides = [1, 1]} : vector<16x128xf32> to vector<1x128xf32>
    %152 = arith.mulf %150, %151 : vector<1x128xf32>
    %153 = vector.extract_strided_slice %8 {offsets = [13, 0], sizes = [1, 128], strides = [1, 1]} : vector<16x128xf32> to vector<1x128xf32>
    %154 = arith.mulf %150, %153 : vector<1x128xf32>
    %155 = vector.broadcast %152 : vector<1x128xf32> to vector<4x128xf32>
    %156 = arith.mulf %155, %148 : vector<4x128xf32>
    %157 = arith.addf %141, %156 : vector<4x128xf32>
    %158 = vector.broadcast %154 : vector<1x128xf32> to vector<4x128xf32>
    %159 = arith.mulf %158, %149 : vector<4x128xf32>
    %160 = arith.addf %157, %159 : vector<4x128xf32>
    %161 = vector.broadcast %154 : vector<1x128xf32> to vector<4x128xf32>
    %162 = arith.mulf %161, %148 : vector<4x128xf32>
    %163 = arith.addf %147, %162 : vector<4x128xf32>
    %164 = vector.broadcast %152 : vector<1x128xf32> to vector<4x128xf32>
    %165 = arith.mulf %164, %149 : vector<4x128xf32>
    %166 = arith.subf %163, %165 : vector<4x128xf32>
    %c8 = arith.constant 8 : index
    %c0_13 = arith.constant 0 : index
    %167 = vector.load %arg6[%c8, %c0_13] : memref<32x128xf32, #tpu.memory_space<vmem>>, vector<4x128xf32>
    tpu.vector_store %arg6[%c8, %c0_13], %160 {strides = array<i32>} : memref<32x128xf32, #tpu.memory_space<vmem>>, vector<4x128xf32>,
    %c12 = arith.constant 12 : index
    %c0_14 = arith.constant 0 : index
    %168 = vector.load %arg6[%c12, %c0_14] : memref<32x128xf32, #tpu.memory_space<vmem>>, vector<4x128xf32>
    tpu.vector_store %arg6[%c12, %c0_14], %166 {strides = array<i32>} : memref<32x128xf32, #tpu.memory_space<vmem>>, vector<4x128xf32>,
    %cst_15 = arith.constant 0.000000e+00 : f32
    %169 = vector.broadcast %cst_15 : f32 to vector<4x128xf32>
    %cst_16 = arith.constant 0.000000e+00 : f32
    %170 = vector.broadcast %cst_16 : f32 to vector<4x128xf32>
    %171 = vector.extract_strided_slice %7 {offsets = [0, 0], sizes = [4, 128], strides = [1, 1]} : vector<16x128xf32> to vector<4x128xf32>
    %172 = vector.extract_strided_slice %8 {offsets = [0, 0], sizes = [4, 128], strides = [1, 1]} : vector<16x128xf32> to vector<4x128xf32>
    %173 = vector.extract_strided_slice %6 {offsets = [0, 0], sizes = [1, 128], strides = [1, 1]} : vector<4x128xf32> to vector<1x128xf32>
    %174 = vector.extract_strided_slice %7 {offsets = [2, 0], sizes = [1, 128], strides = [1, 1]} : vector<16x128xf32> to vector<1x128xf32>
    %175 = arith.mulf %173, %174 : vector<1x128xf32>
    %176 = vector.extract_strided_slice %8 {offsets = [2, 0], sizes = [1, 128], strides = [1, 1]} : vector<16x128xf32> to vector<1x128xf32>
    %177 = arith.mulf %173, %176 : vector<1x128xf32>
    %178 = vector.broadcast %175 : vector<1x128xf32> to vector<4x128xf32>
    %179 = arith.mulf %178, %171 : vector<4x128xf32>
    %180 = arith.addf %169, %179 : vector<4x128xf32>
    %181 = vector.broadcast %177 : vector<1x128xf32> to vector<4x128xf32>
    %182 = arith.mulf %181, %172 : vector<4x128xf32>
    %183 = arith.addf %180, %182 : vector<4x128xf32>
    %184 = vector.broadcast %177 : vector<1x128xf32> to vector<4x128xf32>
    %185 = arith.mulf %184, %171 : vector<4x128xf32>
    %186 = arith.addf %170, %185 : vector<4x128xf32>
    %187 = vector.broadcast %175 : vector<1x128xf32> to vector<4x128xf32>
    %188 = arith.mulf %187, %172 : vector<4x128xf32>
    %189 = arith.subf %186, %188 : vector<4x128xf32>
    %190 = vector.extract_strided_slice %7 {offsets = [4, 0], sizes = [4, 128], strides = [1, 1]} : vector<16x128xf32> to vector<4x128xf32>
    %191 = vector.extract_strided_slice %8 {offsets = [4, 0], sizes = [4, 128], strides = [1, 1]} : vector<16x128xf32> to vector<4x128xf32>
    %192 = vector.extract_strided_slice %6 {offsets = [1, 0], sizes = [1, 128], strides = [1, 1]} : vector<4x128xf32> to vector<1x128xf32>
    %193 = vector.extract_strided_slice %7 {offsets = [6, 0], sizes = [1, 128], strides = [1, 1]} : vector<16x128xf32> to vector<1x128xf32>
    %194 = arith.mulf %192, %193 : vector<1x128xf32>
    %195 = vector.extract_strided_slice %8 {offsets = [6, 0], sizes = [1, 128], strides = [1, 1]} : vector<16x128xf32> to vector<1x128xf32>
    %196 = arith.mulf %192, %195 : vector<1x128xf32>
    %197 = vector.broadcast %194 : vector<1x128xf32> to vector<4x128xf32>
    %198 = arith.mulf %197, %190 : vector<4x128xf32>
    %199 = arith.addf %183, %198 : vector<4x128xf32>
    %200 = vector.broadcast %196 : vector<1x128xf32> to vector<4x128xf32>
    %201 = arith.mulf %200, %191 : vector<4x128xf32>
    %202 = arith.addf %199, %201 : vector<4x128xf32>
    %203 = vector.broadcast %196 : vector<1x128xf32> to vector<4x128xf32>
    %204 = arith.mulf %203, %190 : vector<4x128xf32>
    %205 = arith.addf %189, %204 : vector<4x128xf32>
    %206 = vector.broadcast %194 : vector<1x128xf32> to vector<4x128xf32>
    %207 = arith.mulf %206, %191 : vector<4x128xf32>
    %208 = arith.subf %205, %207 : vector<4x128xf32>
    %209 = vector.extract_strided_slice %7 {offsets = [8, 0], sizes = [4, 128], strides = [1, 1]} : vector<16x128xf32> to vector<4x128xf32>
    %210 = vector.extract_strided_slice %8 {offsets = [8, 0], sizes = [4, 128], strides = [1, 1]} : vector<16x128xf32> to vector<4x128xf32>
    %211 = vector.extract_strided_slice %6 {offsets = [2, 0], sizes = [1, 128], strides = [1, 1]} : vector<4x128xf32> to vector<1x128xf32>
    %212 = vector.extract_strided_slice %7 {offsets = [10, 0], sizes = [1, 128], strides = [1, 1]} : vector<16x128xf32> to vector<1x128xf32>
    %213 = arith.mulf %211, %212 : vector<1x128xf32>
    %214 = vector.extract_strided_slice %8 {offsets = [10, 0], sizes = [1, 128], strides = [1, 1]} : vector<16x128xf32> to vector<1x128xf32>
    %215 = arith.mulf %211, %214 : vector<1x128xf32>
    %216 = vector.broadcast %213 : vector<1x128xf32> to vector<4x128xf32>
    %217 = arith.mulf %216, %209 : vector<4x128xf32>
    %218 = arith.addf %202, %217 : vector<4x128xf32>
    %219 = vector.broadcast %215 : vector<1x128xf32> to vector<4x128xf32>
    %220 = arith.mulf %219, %210 : vector<4x128xf32>
    %221 = arith.addf %218, %220 : vector<4x128xf32>
    %222 = vector.broadcast %215 : vector<1x128xf32> to vector<4x128xf32>
    %223 = arith.mulf %222, %209 : vector<4x128xf32>
    %224 = arith.addf %208, %223 : vector<4x128xf32>
    %225 = vector.broadcast %213 : vector<1x128xf32> to vector<4x128xf32>
    %226 = arith.mulf %225, %210 : vector<4x128xf32>
    %227 = arith.subf %224, %226 : vector<4x128xf32>
    %228 = vector.extract_strided_slice %7 {offsets = [12, 0], sizes = [4, 128], strides = [1, 1]} : vector<16x128xf32> to vector<4x128xf32>
    %229 = vector.extract_strided_slice %8 {offsets = [12, 0], sizes = [4, 128], strides = [1, 1]} : vector<16x128xf32> to vector<4x128xf32>
    %230 = vector.extract_strided_slice %6 {offsets = [3, 0], sizes = [1, 128], strides = [1, 1]} : vector<4x128xf32> to vector<1x128xf32>
    %231 = vector.extract_strided_slice %7 {offsets = [14, 0], sizes = [1, 128], strides = [1, 1]} : vector<16x128xf32> to vector<1x128xf32>
    %232 = arith.mulf %230, %231 : vector<1x128xf32>
    %233 = vector.extract_strided_slice %8 {offsets = [14, 0], sizes = [1, 128], strides = [1, 1]} : vector<16x128xf32> to vector<1x128xf32>
    %234 = arith.mulf %230, %233 : vector<1x128xf32>
    %235 = vector.broadcast %232 : vector<1x128xf32> to vector<4x128xf32>
    %236 = arith.mulf %235, %228 : vector<4x128xf32>
    %237 = arith.addf %221, %236 : vector<4x128xf32>
    %238 = vector.broadcast %234 : vector<1x128xf32> to vector<4x128xf32>
    %239 = arith.mulf %238, %229 : vector<4x128xf32>
    %240 = arith.addf %237, %239 : vector<4x128xf32>
    %241 = vector.broadcast %234 : vector<1x128xf32> to vector<4x128xf32>
    %242 = arith.mulf %241, %228 : vector<4x128xf32>
    %243 = arith.addf %227, %242 : vector<4x128xf32>
    %244 = vector.broadcast %232 : vector<1x128xf32> to vector<4x128xf32>
    %245 = arith.mulf %244, %229 : vector<4x128xf32>
    %246 = arith.subf %243, %245 : vector<4x128xf32>
    %c16 = arith.constant 16 : index
    %c0_17 = arith.constant 0 : index
    %247 = vector.load %arg6[%c16, %c0_17] : memref<32x128xf32, #tpu.memory_space<vmem>>, vector<4x128xf32>
    tpu.vector_store %arg6[%c16, %c0_17], %240 {strides = array<i32>} : memref<32x128xf32, #tpu.memory_space<vmem>>, vector<4x128xf32>,
    %c20 = arith.constant 20 : index
    %c0_18 = arith.constant 0 : index
    %248 = vector.load %arg6[%c20, %c0_18] : memref<32x128xf32, #tpu.memory_space<vmem>>, vector<4x128xf32>
    tpu.vector_store %arg6[%c20, %c0_18], %246 {strides = array<i32>} : memref<32x128xf32, #tpu.memory_space<vmem>>, vector<4x128xf32>,
    %cst_19 = arith.constant 0.000000e+00 : f32
    %249 = vector.broadcast %cst_19 : f32 to vector<4x128xf32>
    %cst_20 = arith.constant 0.000000e+00 : f32
    %250 = vector.broadcast %cst_20 : f32 to vector<4x128xf32>
    %251 = vector.extract_strided_slice %7 {offsets = [0, 0], sizes = [4, 128], strides = [1, 1]} : vector<16x128xf32> to vector<4x128xf32>
    %252 = vector.extract_strided_slice %8 {offsets = [0, 0], sizes = [4, 128], strides = [1, 1]} : vector<16x128xf32> to vector<4x128xf32>
    %253 = vector.extract_strided_slice %6 {offsets = [0, 0], sizes = [1, 128], strides = [1, 1]} : vector<4x128xf32> to vector<1x128xf32>
    %254 = vector.extract_strided_slice %7 {offsets = [3, 0], sizes = [1, 128], strides = [1, 1]} : vector<16x128xf32> to vector<1x128xf32>
    %255 = arith.mulf %253, %254 : vector<1x128xf32>
    %256 = vector.extract_strided_slice %8 {offsets = [3, 0], sizes = [1, 128], strides = [1, 1]} : vector<16x128xf32> to vector<1x128xf32>
    %257 = arith.mulf %253, %256 : vector<1x128xf32>
    %258 = vector.broadcast %255 : vector<1x128xf32> to vector<4x128xf32>
    %259 = arith.mulf %258, %251 : vector<4x128xf32>
    %260 = arith.addf %249, %259 : vector<4x128xf32>
    %261 = vector.broadcast %257 : vector<1x128xf32> to vector<4x128xf32>
    %262 = arith.mulf %261, %252 : vector<4x128xf32>
    %263 = arith.addf %260, %262 : vector<4x128xf32>
    %264 = vector.broadcast %257 : vector<1x128xf32> to vector<4x128xf32>
    %265 = arith.mulf %264, %251 : vector<4x128xf32>
    %266 = arith.addf %250, %265 : vector<4x128xf32>
    %267 = vector.broadcast %255 : vector<1x128xf32> to vector<4x128xf32>
    %268 = arith.mulf %267, %252 : vector<4x128xf32>
    %269 = arith.subf %266, %268 : vector<4x128xf32>
    %270 = vector.extract_strided_slice %7 {offsets = [4, 0], sizes = [4, 128], strides = [1, 1]} : vector<16x128xf32> to vector<4x128xf32>
    %271 = vector.extract_strided_slice %8 {offsets = [4, 0], sizes = [4, 128], strides = [1, 1]} : vector<16x128xf32> to vector<4x128xf32>
    %272 = vector.extract_strided_slice %6 {offsets = [1, 0], sizes = [1, 128], strides = [1, 1]} : vector<4x128xf32> to vector<1x128xf32>
    %273 = vector.extract_strided_slice %7 {offsets = [7, 0], sizes = [1, 128], strides = [1, 1]} : vector<16x128xf32> to vector<1x128xf32>
    %274 = arith.mulf %272, %273 : vector<1x128xf32>
    %275 = vector.extract_strided_slice %8 {offsets = [7, 0], sizes = [1, 128], strides = [1, 1]} : vector<16x128xf32> to vector<1x128xf32>
    %276 = arith.mulf %272, %275 : vector<1x128xf32>
    %277 = vector.broadcast %274 : vector<1x128xf32> to vector<4x128xf32>
    %278 = arith.mulf %277, %270 : vector<4x128xf32>
    %279 = arith.addf %263, %278 : vector<4x128xf32>
    %280 = vector.broadcast %276 : vector<1x128xf32> to vector<4x128xf32>
    %281 = arith.mulf %280, %271 : vector<4x128xf32>
    %282 = arith.addf %279, %281 : vector<4x128xf32>
    %283 = vector.broadcast %276 : vector<1x128xf32> to vector<4x128xf32>
    %284 = arith.mulf %283, %270 : vector<4x128xf32>
    %285 = arith.addf %269, %284 : vector<4x128xf32>
    %286 = vector.broadcast %274 : vector<1x128xf32> to vector<4x128xf32>
    %287 = arith.mulf %286, %271 : vector<4x128xf32>
    %288 = arith.subf %285, %287 : vector<4x128xf32>
    %289 = vector.extract_strided_slice %7 {offsets = [8, 0], sizes = [4, 128], strides = [1, 1]} : vector<16x128xf32> to vector<4x128xf32>
    %290 = vector.extract_strided_slice %8 {offsets = [8, 0], sizes = [4, 128], strides = [1, 1]} : vector<16x128xf32> to vector<4x128xf32>
    %291 = vector.extract_strided_slice %6 {offsets = [2, 0], sizes = [1, 128], strides = [1, 1]} : vector<4x128xf32> to vector<1x128xf32>
    %292 = vector.extract_strided_slice %7 {offsets = [11, 0], sizes = [1, 128], strides = [1, 1]} : vector<16x128xf32> to vector<1x128xf32>
    %293 = arith.mulf %291, %292 : vector<1x128xf32>
    %294 = vector.extract_strided_slice %8 {offsets = [11, 0], sizes = [1, 128], strides = [1, 1]} : vector<16x128xf32> to vector<1x128xf32>
    %295 = arith.mulf %291, %294 : vector<1x128xf32>
    %296 = vector.broadcast %293 : vector<1x128xf32> to vector<4x128xf32>
    %297 = arith.mulf %296, %289 : vector<4x128xf32>
    %298 = arith.addf %282, %297 : vector<4x128xf32>
    %299 = vector.broadcast %295 : vector<1x128xf32> to vector<4x128xf32>
    %300 = arith.mulf %299, %290 : vector<4x128xf32>
    %301 = arith.addf %298, %300 : vector<4x128xf32>
    %302 = vector.broadcast %295 : vector<1x128xf32> to vector<4x128xf32>
    %303 = arith.mulf %302, %289 : vector<4x128xf32>
    %304 = arith.addf %288, %303 : vector<4x128xf32>
    %305 = vector.broadcast %293 : vector<1x128xf32> to vector<4x128xf32>
    %306 = arith.mulf %305, %290 : vector<4x128xf32>
    %307 = arith.subf %304, %306 : vector<4x128xf32>
    %308 = vector.extract_strided_slice %7 {offsets = [12, 0], sizes = [4, 128], strides = [1, 1]} : vector<16x128xf32> to vector<4x128xf32>
    %309 = vector.extract_strided_slice %8 {offsets = [12, 0], sizes = [4, 128], strides = [1, 1]} : vector<16x128xf32> to vector<4x128xf32>
    %310 = vector.extract_strided_slice %6 {offsets = [3, 0], sizes = [1, 128], strides = [1, 1]} : vector<4x128xf32> to vector<1x128xf32>
    %311 = vector.extract_strided_slice %7 {offsets = [15, 0], sizes = [1, 128], strides = [1, 1]} : vector<16x128xf32> to vector<1x128xf32>
    %312 = arith.mulf %310, %311 : vector<1x128xf32>
    %313 = vector.extract_strided_slice %8 {offsets = [15, 0], sizes = [1, 128], strides = [1, 1]} : vector<16x128xf32> to vector<1x128xf32>
    %314 = arith.mulf %310, %313 : vector<1x128xf32>
    %315 = vector.broadcast %312 : vector<1x128xf32> to vector<4x128xf32>
    %316 = arith.mulf %315, %308 : vector<4x128xf32>
    %317 = arith.addf %301, %316 : vector<4x128xf32>
    %318 = vector.broadcast %314 : vector<1x128xf32> to vector<4x128xf32>
    %319 = arith.mulf %318, %309 : vector<4x128xf32>
    %320 = arith.addf %317, %319 : vector<4x128xf32>
    %321 = vector.broadcast %314 : vector<1x128xf32> to vector<4x128xf32>
    %322 = arith.mulf %321, %308 : vector<4x128xf32>
    %323 = arith.addf %307, %322 : vector<4x128xf32>
    %324 = vector.broadcast %312 : vector<1x128xf32> to vector<4x128xf32>
    %325 = arith.mulf %324, %309 : vector<4x128xf32>
    %326 = arith.subf %323, %325 : vector<4x128xf32>
    %c24 = arith.constant 24 : index
    %c0_21 = arith.constant 0 : index
    %327 = vector.load %arg6[%c24, %c0_21] : memref<32x128xf32, #tpu.memory_space<vmem>>, vector<4x128xf32>
    tpu.vector_store %arg6[%c24, %c0_21], %320 {strides = array<i32>} : memref<32x128xf32, #tpu.memory_space<vmem>>, vector<4x128xf32>,
    %c28 = arith.constant 28 : index
    %c0_22 = arith.constant 0 : index
    %328 = vector.load %arg6[%c28, %c0_22] : memref<32x128xf32, #tpu.memory_space<vmem>>, vector<4x128xf32>
    tpu.vector_store %arg6[%c28, %c0_22], %326 {strides = array<i32>} : memref<32x128xf32, #tpu.memory_space<vmem>>, vector<4x128xf32>,
    %c0_23 = arith.constant 0 : index
    %c0_24 = arith.constant 0 : index
    %329 = vector.load %arg4[%c0_23, %c0_24] : memref<16x32xf32, #tpu.memory_space<vmem>>, vector<16x32xf32>
    %c0_25 = arith.constant 0 : index
    %c0_26 = arith.constant 0 : index
    %330 = vector.load %arg6[%c0_25, %c0_26] : memref<32x128xf32, #tpu.memory_space<vmem>>, vector<32x128xf32>
    %cst_27 = arith.constant dense<0.000000e+00> : vector<16x128xf32>
    %331 = tpu.matmul %329, %330, %cst_27 {dimension_numbers = #tpu.dot_dimension_numbers<[1], [0], [0], [1], [0, 0, 1, 1], [], []>} : vector<16x32xf32>, vector<32x128xf32>, vector<16x128xf32> -> vector<16x128xf32>
    %c0_28 = arith.constant 0 : index
    %c0_29 = arith.constant 0 : index
    %332 = vector.load %arg5[%c0_28, %c0_29] : memref<16x128xf32, #tpu.memory_space<vmem>>, vector<16x128xf32>
    tpu.vector_store %arg5[%c0_28, %c0_29], %331 {strides = array<i32>} : memref<16x128xf32, #tpu.memory_space<vmem>>, vector<16x128xf32>,
    return
  }
  func.func @transform_0(%arg0: i32) -> (i32, i32) {
    %c0_i32 = arith.constant 0 : i32
    %c0_i32_0 = arith.constant 0 : i32
    return %c0_i32, %arg0 : i32, i32
  }
  func.func @transform_1(%arg0: i32) -> (i32, i32) {
    %c0_i32 = arith.constant 0 : i32
    %c0_i32_0 = arith.constant 0 : i32
    return %c0_i32, %arg0 : i32, i32
  }
  func.func @transform_2(%arg0: i32) -> (i32, i32) {
    %c0_i32 = arith.constant 0 : i32
    %c0_i32_0 = arith.constant 0 : i32
    return %c0_i32, %arg0 : i32, i32
  }
  func.func @transform_3(%arg0: i32) -> (i32, i32) {
    %c0_i32 = arith.constant 0 : i32
    %c0_i32_0 = arith.constant 0 : i32
    %c0_i32_1 = arith.constant 0 : i32
    return %c0_i32, %c0_i32_0 : i32, i32
  }
  func.func @transform_4(%arg0: i32) -> (i32, i32) {
    %c0_i32 = arith.constant 0 : i32
    %c0_i32_0 = arith.constant 0 : i32
    return %c0_i32, %arg0 : i32, i32
  }
}

</mosaic_0001>

<bundles_post_ra>
// kernel: tpu_custom_call.1
= control target key start
LH: loop header
LB: loop body
LE: loop exit
PB: predicated region body
PF: predicated region fallthrough
CT: control target
= control target key end

     0   :  { %9 = vsyncpa [#allocation4], 0  ;;  %s853_s0 = inlined_call_operand.hbm [shape: f32[4,128], index: 0, kind: input, shape index: {}]   ;;  %s854_s1 = inlined_call_operand.hbm [shape: f32[16,128], index: 1, kind: input, shape index: {}]   ;;  %s855_s2 = inlined_call_operand.hbm [shape: f32[16,128], index: 2, kind: input, shape index: {}]   ;;  %s856_s3 = inlined_call_operand.hbm [shape: f32[16,32], index: 3, kind: input, shape index: {}]   ;;  %s857_s4 = inlined_call_operand.hbm [shape: f32[16,128], index: 4, kind: output, shape index: {}]  }
   0x1   :  { %10 = vsyncpa [#allocation7], 0 }
   0x2   :  { %11 = vsyncpa [#allocation10], 0  ;;  %s28_s17 = sshll.u32 %s854_s1, 4  ;;  %s29_s17 = int_to_ptr.hbm [resolvable:$true] %s28_s17 }
   0x3   :  { %12 = vsyncpa [#allocation5], 0  ;;  %s632_s18 = smov [#allocation6]   ;;  %s18_s22 = sshll.u32 %s853_s0, 4  ;;  %s19_s22 = int_to_ptr.hbm [resolvable:$true] %s18_s22 }
   0x4   :  { %s30_s19 = sshll.u32 %s632_s18, 4  ;;  %s633_s23 = smov 128   ;;  %s31_s19 = int_to_ptr.vmem [resolvable:$true] %s30_s19 }
   0x5   :  { %s634_s24 = smov 8   ;;  %s635_s25 = smov [#allocation3]  }
   0x6   :  { %36 = dma.hbm_to_vmem [thread:$0]  %s29_s17, 256, %s31_s19, [#allocation7], %s633_s23, %s633_s23, %s634_s24  }
   0x7   :  { %s20_s26 = sshll.u32 %s635_s25, 4  ;;  %s41_s28 = sshll.u32 %s855_s2, 4  ;;  %s21_s26 = int_to_ptr.vmem [resolvable:$true] %s20_s26  ;;  %s42_s28 = int_to_ptr.hbm [resolvable:$true] %s41_s28 }
   0x8   :  { %23 = dma.hbm_to_vmem [thread:$0]  %s19_s22, 64, %s21_s26, [#allocation4]  }
   0x9   :  { %s54_s0 = sshll.u32 %s856_s3, 4  ;;  %s636_s5 = smov [#allocation8]   ;;  %s55_s0 = int_to_ptr.hbm [resolvable:$true] %s54_s0 }
   0xa   :  { %s43_s6 = sshll.u32 %s636_s5, 4  ;;  %s637_s7 = smov [#allocation9]   ;;  %s44_s6 = int_to_ptr.vmem [resolvable:$true] %s43_s6 }
   0xb   :  { %49 = dma.hbm_to_vmem [thread:$0]  %s42_s28, 256, %s44_s6, [#allocation7], %s633_s23, %s633_s23, %s634_s24  }
   0xc   :  { %s56_s8 = sshll.u32 %s637_s7, 4  ;;  %s57_s8 = int_to_ptr.vmem [resolvable:$true] %s56_s8 }
   0xd   :  { %62 = dma.hbm_to_vmem [thread:$0]  %s55_s0, 256, %s57_s8, [#allocation10], %s633_s23, %s633_s23, %s634_s24  }
   0xe   :  { %624 = dma.done.wait [#allocation4], 64  }
   0xf   :  { %625 = vsyncadd [#allocation4], 4294967232 }
  0x10   :  { %626 = dma.done.wait [#allocation7], 512  }
  0x11   :  { %627 = vsyncadd [#allocation7], 4294966784 }
  0x12   :  { %628 = dma.done.wait [#allocation10], 256  }
  0x13   :  { %629 = vsyncadd [#allocation10], 4294967040  ;;  %v79_v0 = vld [vmem:[#allocation3] sm:$0xf]  ;;  %v685_v1 = vld [vmem:[#allocation6] sm:$0xff]  ;;  %vm438_vm0 = vcmask 261120  }
  0x14   :  { %v687_v2 = vld [vmem:[#allocation6 + $0x8] sm:$0xff]  ;;  %v80_v3 = vmul.f32 0.15915494, %v79_v0  ;;  %v689_v4 = vld [vmem:[#allocation8] sm:$0xff]  ;;  %v691_v5 = vld [vmem:[#allocation8 + $0x8] sm:$0xff]  ;;  %v101_v7 = vrot.slane %v685_v1, 3 }
  0x15   :  { %v148_v8 = vrot.slane %v687_v2, 1  ;;  %v105_v9 = vrot.slane %v689_v4, 3  ;;  %v151_v10 = vrot.slane %v691_v5, 1  ;;  %v364_v11 = vrot.slane %v685_v1, 6  ;;  %s638_s2 = smov [#allocation11]   ;;  %s476_s11 = sshll.u32 %s857_s4, 4  ;;  %s477_s11 = int_to_ptr.hbm [resolvable:$true] %s476_s11 }
  0x16   :  { %v81_v6 = vfloor.f32 %v80_v3  ;;  %v367_v12 = vrot.slane %v689_v4, 6  ;;  %v402_v14 = vrot.slane %v687_v2, 4  ;;  %v405_v15 = vrot.slane %v691_v5, 4  ;;  %s474_s3 = sshll.u32 %s638_s2, 4  ;;  %s475_s3 = int_to_ptr.vmem [resolvable:$true] %s474_s3 }
  0x17   :  { %v268_v16 = vrot.slane %v685_v1, 2  ;;  %v271_v17 = vrot.slane %v689_v4, 2  ;;  %v284_v18 = vrot.slane %v685_v1, 5  ;;  %v287_v19 = vrot.slane %v689_v4, 5 }
  0x18   :  { %v82_v13 = vmul.f32 6.2831855, %v81_v6  ;;  %v324_v20 = vrot.slane %v687_v2, 3  ;;  %v327_v22 = vrot.slane %v691_v5, 3  ;;  %v178_v23 = vrot.slane %v685_v1, 1 }
  0x19   :  { %v181_v24 = vrot.slane %v689_v4, 1  ;;  %v194_v25 = vrot.slane %v685_v1, 4  ;;  %v197_v26 = vrot.slane %v689_v4, 4  ;;  %v222_v27 = vrot.slane %v687_v2, 7 }
  0x1a   :  { %v706_v21 = vsub.f32 %v79_v0, %v82_v13  ;;  %v225_v28 = vrot.slane %v691_v5, 7 }
  0x1c   :  { %v716_v29 = vmul.f32 %v101_v7, %v706_v21  ;;  %v719_v30 = vmul.f32 %v105_v9, %v706_v21  ;;  %v722_v31 = vmul.f32 %v148_v8, %v706_v21  ;;  %v725_v32 = vmul.f32 %v151_v10, %v706_v21 }
  0x1d   :  { %v366_v33 = vmul.f32 %v364_v11, %v706_v21  ;;  %v369_v34 = vmul.f32 %v367_v12, %v706_v21  ;;  %v404_v35 = vmul.f32 %v402_v14, %v706_v21  ;;  %v407_v36 = vmul.f32 %v405_v15, %v706_v21 }
  0x1e   :  { %v354_v37 = vperm.slane %v716_v29, 0  ;;  %v357_v38 = vperm.slane %v719_v30, 0  ;;  %v392_v39 = vperm.slane %v722_v31, 2  ;;  %v395_v40 = vperm.slane %v725_v32, 2 }
  0x1f   :  { %v370_v41 = vperm.slane %v366_v33, 1  ;;  %v376_v42 = vperm.slane %v369_v34, 1  ;;  %v408_v43 = vperm.slane %v404_v35, 3  ;;  %v414_v44 = vperm.slane %v407_v36, 3 }
  0x20   :  { %v355_v45 = vmul.f32 %v354_v37, %v685_v1  ;;  %v358_v46 = vmul.f32 %v357_v38, %v689_v4  ;;  %v360_v47 = vmul.f32 %v357_v38, %v685_v1  ;;  %v362_v48 = vmul.f32 %v354_v37, %v689_v4 }
  0x21   :  { %v371_v49 = vmul.f32 %v370_v41, %v685_v1  ;;  %v377_v50 = vmul.f32 %v376_v42, %v689_v4  ;;  %v382_v51 = vmul.f32 %v376_v42, %v685_v1  ;;  %v387_v52 = vmul.f32 %v370_v41, %v689_v4 }
  0x22   :  { %v359_v53 = vadd.f32 %v358_v46, %v355_v45  ;;  %v363_v54 = vsub.f32 %v360_v47, %v362_v48  ;;  %v393_v55 = vmul.f32 %v392_v39, %v687_v2  ;;  %v396_v56 = vmul.f32 %v395_v40, %v691_v5 }
  0x23   :  { %v373_v57 = vrot.slane %v371_v49, 4  ;;  %v379_v58 = vrot.slane %v377_v50, 4  ;;  %v384_v59 = vrot.slane %v382_v51, 4  ;;  %v389_v60 = vrot.slane %v387_v52, 4 }
  0x24   :  { %v398_v61 = vmul.f32 %v395_v40, %v687_v2  ;;  %v400_v62 = vmul.f32 %v392_v39, %v691_v5  ;;  %v409_v63 = vmul.f32 %v408_v43, %v687_v2  ;;  %v415_v0 = vmul.f32 %v414_v44, %v691_v5 }
  0x25   :  { %v375_v3 = vadd.f32 %v373_v57, %v359_v53  ;;  %v386_v6 = vadd.f32 %v384_v59, %v363_v54  ;;  %v420_v7 = vmul.f32 %v414_v44, %v687_v2  ;;  %v425_v8 = vmul.f32 %v408_v43, %v691_v5 }
  0x26   :  { %v411_v9 = vrot.slane %v409_v63, 4  ;;  %v417_v10 = vrot.slane %v415_v0, 4  ;;  %v270_v11 = vmul.f32 %v268_v16, %v706_v21  ;;  %v273_v12 = vmul.f32 %v271_v17, %v706_v21 }
  0x27   :  { %v381_v13 = vadd.f32 %v379_v58, %v375_v3  ;;  %v391_v14 = vsub.f32 %v386_v6, %v389_v60  ;;  %v422_v15 = vrot.slane %v420_v7, 4  ;;  %v427_v33 = vrot.slane %v425_v8, 4 }
  0x28   :  { %v274_v34 = vperm.slane %v270_v11, 0  ;;  %v277_v35 = vperm.slane %v273_v12, 0  ;;  %v286_v36 = vmul.f32 %v284_v18, %v706_v21  ;;  %v289_v37 = vmul.f32 %v287_v19, %v706_v21 }
  0x29   :  { %v394_v38 = vadd.f32 %v393_v55, %v381_v13  ;;  %v399_v39 = vadd.f32 %v398_v61, %v391_v14  ;;  %v312_v40 = vmul.f32 %v687_v2, %v706_v21  ;;  %v313_v16 = vmul.f32 %v691_v5, %v706_v21 }
  0x2a   :  { %v275_v17 = vmul.f32 %v274_v34, %v685_v1  ;;  %v278_v41 = vmul.f32 %v277_v35, %v689_v4  ;;  %v280_v42 = vmul.f32 %v277_v35, %v685_v1  ;;  %v282_v43 = vmul.f32 %v274_v34, %v689_v4 }
  0x2b   :  { %v397_v44 = vadd.f32 %v396_v56, %v394_v38  ;;  %v401_v18 = vsub.f32 %v399_v39, %v400_v62  ;;  %v290_v45 = vperm.slane %v286_v36, 1  ;;  %v296_v19 = vperm.slane %v289_v37, 1 }
  0x2c   :  { %v279_v46 = vadd.f32 %v278_v41, %v275_v17  ;;  %v283_v47 = vsub.f32 %v280_v42, %v282_v43  ;;  %v314_v48 = vperm.slane %v312_v40, 2  ;;  %v317_v49 = vperm.slane %v313_v16, 2 }
  0x2d   :  { %v413_v50 = vadd.f32 %v411_v9, %v397_v44  ;;  %v424_v51 = vadd.f32 %v422_v15, %v401_v18  ;;  %v291_v52 = vmul.f32 %v290_v45, %v685_v1  ;;  %v297_v53 = vmul.f32 %v296_v19, %v689_v4 }
  0x2e   :  { %v302_v54 = vmul.f32 %v296_v19, %v685_v1  ;;  %v307_v55 = vmul.f32 %v290_v45, %v689_v4  ;;  %v315_v57 = vmul.f32 %v314_v48, %v687_v2  ;;  %v318_v56 = vmul.f32 %v317_v49, %v691_v5 }
  0x2f   :  { %v419_v58 = vadd.f32 %v417_v10, %v413_v50  ;;  %v429_v59 = vsub.f32 %v424_v51, %v427_v33  ;;  %v293_v60 = vrot.slane %v291_v52, 4  ;;  %v299_v61 = vrot.slane %v297_v53, 4 }
  0x30   :  { %v304_v62 = vrot.slane %v302_v54, 4  ;;  %v309_v63 = vrot.slane %v307_v55, 4  ;;  %v320_v0 = vmul.f32 %v317_v49, %v687_v2  ;;  %v322_v3 = vmul.f32 %v314_v48, %v691_v5 }
  0x31   :  { %430 = vst [vmem:[#allocation2 + $0x18] sm:$0xf] %v419_v58  ;;  %v295_v6 = vadd.f32 %v293_v60, %v279_v46  ;;  %v326_v7 = vmul.f32 %v324_v20, %v706_v21  ;;  %v329_v8 = vmul.f32 %v327_v22, %v706_v21  ;;  %v180_v9 = vmul.f32 %v178_v23, %v706_v21 }
  0x32   :  { %431 = vst [vmem:[#allocation2 + $0x1c] sm:$0xf] %v429_v59  ;;  %v306_v10 = vadd.f32 %v304_v62, %v283_v47  ;;  %v183_v11 = vmul.f32 %v181_v24, %v706_v21  ;;  %v196_v12 = vmul.f32 %v194_v25, %v706_v21  ;;  %v199_v20 = vmul.f32 %v197_v26, %v706_v21 }
  0x33   :  { %v301_v13 = vadd.f32 %v299_v61, %v295_v6  ;;  %v330_v22 = vperm.slane %v326_v7, 3  ;;  %v336_v14 = vperm.slane %v329_v8, 3  ;;  %v184_v15 = vperm.slane %v180_v9, 0 }
  0x34   :  { %v311_v33 = vsub.f32 %v306_v10, %v309_v63  ;;  %v187_v23 = vperm.slane %v183_v11, 0  ;;  %v200_v34 = vperm.slane %v196_v12, 1  ;;  %v206_v35 = vperm.slane %v199_v20, 1 }
  0x35   :  { %v316_v36 = vadd.f32 %v315_v57, %v301_v13  ;;  %v331_v37 = vmul.f32 %v330_v22, %v687_v2  ;;  %v337_v24 = vmul.f32 %v336_v14, %v691_v5  ;;  %v342_v38 = vmul.f32 %v336_v14, %v687_v2 }
  0x36   :  { %v321_v25 = vadd.f32 %v320_v0, %v311_v33  ;;  %v347_v39 = vmul.f32 %v330_v22, %v691_v5  ;;  %v185_v26 = vmul.f32 %v184_v15, %v685_v1  ;;  %v188_v40 = vmul.f32 %v187_v23, %v689_v4 }
  0x37   :  { %v319_v16 = vadd.f32 %v318_v56, %v316_v36  ;;  %v333_v17 = vrot.slane %v331_v37, 4  ;;  %v339_v41 = vrot.slane %v337_v24, 4  ;;  %v344_v42 = vrot.slane %v342_v38, 4 }
  0x38   :  { %v323_v43 = vsub.f32 %v321_v25, %v322_v3  ;;  %v349_v44 = vrot.slane %v347_v39, 4  ;;  %v189_v18 = vadd.f32 %v188_v40, %v185_v26  ;;  %v190_v45 = vmul.f32 %v187_v23, %v685_v1 }
  0x39   :  { %v437_v19 = vld [vmem:[#allocation2 + $0x18] sm:$0xff]  ;;  %v335_v46 = vadd.f32 %v333_v17, %v319_v16  ;;  %v192_v47 = vmul.f32 %v184_v15, %v689_v4  ;;  %v201_v48 = vmul.f32 %v200_v34, %v685_v1  ;;  %v207_v49 = vmul.f32 %v206_v35, %v689_v4 }
  0x3a   :  { %457 = vmatpush.msra.mxu0 %v437_v19  ;;  %493 = vmatpush.msra.mxu1 %v437_v19  ;;  %v346_v50 = vadd.f32 %v344_v42, %v323_v43  ;;  %v212_v51 = vmul.f32 %v206_v35, %v685_v1  ;;  %v217_v52 = vmul.f32 %v200_v34, %v689_v4  ;;  %v238_v53 = vrot.slane %v687_v2, 2 }
  0x3b   :  { %v341_v54 = vadd.f32 %v339_v41, %v335_v46  ;;  %v193_v55 = vsub.f32 %v190_v45, %v192_v47  ;;  %v203_v57 = vrot.slane %v201_v48, 4  ;;  %v209_v56 = vrot.slane %v207_v49, 4 }
  0x3c   :  { %v351_v58 = vsub.f32 %v346_v50, %v349_v44  ;;  %v214_v59 = vrot.slane %v212_v51, 4  ;;  %v219_v60 = vrot.slane %v217_v52, 4  ;;  %v224_v61 = vmul.f32 %v222_v27, %v706_v21 }
  0x3d   :  { %352 = vst [vmem:[#allocation2 + $0x10] sm:$0xf] %v341_v54  ;;  %v205_v62 = vadd.f32 %v203_v57, %v189_v18  ;;  %v227_v63 = vmul.f32 %v225_v28, %v706_v21  ;;  %v240_v0 = vmul.f32 %v238_v53, %v706_v21  ;;  %v241_v3 = vrot.slane %v691_v5, 2 }
  0x3e   :  { %353 = vst [vmem:[#allocation2 + $0x14] sm:$0xf] %v351_v58  ;;  %v216_v6 = vadd.f32 %v214_v59, %v193_v55  ;;  %v228_v7 = vperm.slane %v224_v61, 2  ;;  %v88_v8 = vmul.f32 %v685_v1, %v706_v21  ;;  %v89_v9 = vmul.f32 %v689_v4, %v706_v21 }
  0x3f   :  { %v211_v27 = vadd.f32 %v209_v56, %v205_v62  ;;  %v231_v10 = vperm.slane %v227_v63, 2  ;;  %v243_v11 = vmul.f32 %v241_v3, %v706_v21  ;;  %v244_v12 = vperm.slane %v240_v0, 3 }
  0x40   :  { %v221_v20 = vsub.f32 %v216_v6, %v219_v60  ;;  %v229_v28 = vmul.f32 %v228_v7, %v687_v2  ;;  %v236_v13 = vmul.f32 %v228_v7, %v691_v5  ;;  %v90_v22 = vperm.slane %v88_v8, 0 }
  0x41   :  { %v232_v14 = vmul.f32 %v231_v10, %v691_v5  ;;  %v234_v15 = vmul.f32 %v231_v10, %v687_v2  ;;  %v245_v33 = vmul.f32 %v244_v12, %v687_v2  ;;  %v250_v23 = vperm.slane %v243_v11, 3 }
  0x42   :  { %v230_v34 = vadd.f32 %v229_v28, %v211_v27  ;;  %v261_v35 = vmul.f32 %v244_v12, %v691_v5  ;;  %v91_v36 = vmul.f32 %v90_v22, %v685_v1  ;;  %v93_v37 = vperm.slane %v89_v9, 0 }
  0x43   :  { %v235_v24 = vadd.f32 %v234_v15, %v221_v20  ;;  %v247_v38 = vrot.slane %v245_v33, 4  ;;  %v251_v25 = vmul.f32 %v250_v23, %v691_v5  ;;  %v256_v39 = vmul.f32 %v250_v23, %v687_v2 }
  0x44   :  { %v233_v26 = vadd.f32 %v232_v14, %v230_v34  ;;  %v263_v40 = vrot.slane %v261_v35, 4  ;;  %v94_v16 = vmul.f32 %v93_v37, %v689_v4  ;;  %v96_v17 = vmul.f32 %v93_v37, %v685_v1 }
  0x45   :  { %v436_v41 = vld [vmem:[#allocation2 + $0x10] sm:$0xff]  ;;  %v237_v42 = vsub.f32 %v235_v24, %v236_v13  ;;  %v253_v43 = vrot.slane %v251_v25, 4  ;;  %v258_v44 = vrot.slane %v256_v39, 4  ;;  %v98_v18 = vmul.f32 %v90_v22, %v689_v4 }
  0x46   :  { %458 = vmatpush.msra.mxu0 %v436_v41  ;;  %494 = vmatpush.msra.mxu1 %v436_v41  ;;  %v249_v45 = vadd.f32 %v247_v38, %v233_v26  ;;  %v95_v19 = vadd.f32 %v94_v16, %v91_v36  ;;  %v108_v46 = vperm.slane %v716_v29, 1  ;;  %v114_v47 = vperm.slane %v719_v30, 1 }
  0x47   :  { %v260_v48 = vadd.f32 %v258_v44, %v237_v42  ;;  %v99_v49 = vsub.f32 %v96_v17, %v98_v18  ;;  %v131_v50 = vrot.slane %v687_v2, 6  ;;  %v135_v51 = vrot.slane %v691_v5, 6 }
  0x48   :  { %v255_v52 = vadd.f32 %v253_v43, %v249_v45  ;;  %v109_v53 = vmul.f32 %v108_v46, %v685_v1  ;;  %v115_v54 = vmul.f32 %v114_v47, %v689_v4  ;;  %v120_v55 = vmul.f32 %v114_v47, %v685_v1 }
  0x49   :  { %v265_v57 = vsub.f32 %v260_v48, %v263_v40  ;;  %v125_v56 = vmul.f32 %v108_v46, %v689_v4  ;;  %v133_v29 = vmul.f32 %v131_v50, %v706_v21  ;;  %v137_v30 = vmul.f32 %v135_v51, %v706_v21 }
  0x4a   :  { %266 = vst [vmem:[#allocation2 + $0x8] sm:$0xf] %v255_v52  ;;  %v111_v58 = vrot.slane %v109_v53, 4  ;;  %v117_v59 = vrot.slane %v115_v54, 4  ;;  %v122_v60 = vrot.slane %v120_v55, 4  ;;  %v154_v61 = vperm.slane %v722_v31, 3 }
  0x4b   :  { %267 = vst [vmem:[#allocation2 + $0xc] sm:$0xf] %v265_v57  ;;  %v127_v62 = vrot.slane %v125_v56, 4  ;;  %v138_v63 = vperm.slane %v133_v29, 2  ;;  %v141_v0 = vperm.slane %v137_v30, 2  ;;  %v160_v3 = vperm.slane %v725_v32, 3 }
  0x4c   :  { %v113_v1 = vadd.f32 %v111_v58, %v95_v19  ;;  %v124_v6 = vadd.f32 %v122_v60, %v99_v49  ;;  %v155_v4 = vmul.f32 %v154_v61, %v687_v2  ;;  %v171_v9 = vmul.f32 %v154_v61, %v691_v5 }
  0x4d   :  { %v139_v7 = vmul.f32 %v138_v63, %v687_v2  ;;  %v142_v21 = vmul.f32 %v141_v0, %v691_v5  ;;  %v144_v8 = vmul.f32 %v141_v0, %v687_v2  ;;  %v146_v10 = vmul.f32 %v138_v63, %v691_v5 }
  0x4e   :  { %v119_v27 = vadd.f32 %v117_v59, %v113_v1  ;;  %v129_v31 = vsub.f32 %v124_v6, %v127_v62  ;;  %v161_v11 = vmul.f32 %v160_v3, %v691_v5  ;;  %v166_v32 = vmul.f32 %v160_v3, %v687_v2  ;;  %v432_v5 = vld [vmem:[#allocation9] sm:$0xff]  ;;  %v433_v2 = vld [vmem:[#allocation9 + $0x8] sm:$0xff] }
  0x4f   :  { %v157_v28 = vrot.slane %v155_v4, 4  ;;  %v173_v23 = vrot.slane %v171_v9, 4 }
  0x50   :  { %v140_v12 = vadd.f32 %v139_v7, %v119_v27  ;;  %v145_v20 = vadd.f32 %v144_v8, %v129_v31  ;;  %v168_v13 = vrot.slane %v166_v32, 4  ;;  %v163_v33 = vrot.slane %v161_v11, 4 }
  0x52   :  { %v435_v22 = vld [vmem:[#allocation2 + $0x8] sm:$0xff]  ;;  %v143_v14 = vadd.f32 %v142_v21, %v140_v12  ;;  %v147_v15 = vsub.f32 %v145_v20, %v146_v10 }
  0x53   :  { %459 = vmatpush.msra.mxu0 %v435_v22  ;;  %495 = vmatpush.msra.mxu1 %v435_v22 }
  0x54   :  { %v159_v34 = vadd.f32 %v157_v28, %v143_v14  ;;  %v170_v35 = vadd.f32 %v168_v13, %v147_v15 }
  0x56   :  { %v165_v36 = vadd.f32 %v163_v33, %v159_v34  ;;  %v175_v37 = vsub.f32 %v170_v35, %v173_v23 }
  0x58   :  { %176 = vst [vmem:[#allocation2] sm:$0xf] %v165_v36 }
  0x59   :  { %177 = vst [vmem:[#allocation2 + $0x4] sm:$0xf] %v175_v37 }
  0x60   :  { %v434_v24 = vld [vmem:[#allocation2] sm:$0xff] }
  0x61   :  { %460 = vmatpush.msra.mxu0 %v434_v24  ;;  %496 = vmatpush.msra.mxu1 %v434_v24 }
  0x62   :  { %491 = vmatmul.msk.f32.vlgmr.msra.gmra.mxu0 %vm438_vm0, %v432_v5  ;;  %492 = vmatmul.msk.f32.vlgmr.msra.gmra.mxu1 %vm438_vm0, %v433_v2 }
  0xdf   :  { %v462_v38 = vpop.f32.mrf.mxu0  ;;  %v465_v25 = vpop.f32.mrf.mxu1 }
  0xe0   :  { %468 = vst [vmem:[#allocation11] sm:$0xff] %v462_v38 }
  0xe1   :  { %469 = vst [vmem:[#allocation11 + $0x8] sm:$0xff] %v465_v25 }
  0xe2   :  { %482 = dma.vmem_to_hbm [thread:$0]  %s475_s3, 256, %s477_s11, [#allocation5], %s633_s23, %s633_s23, %s634_s24  }
  0xe3   :  { %630 = dma.done.wait [#allocation5], 256  }
  0xe4   :  { %631 = vsyncadd [#allocation5], 4294967040 }
  0xe5   :  { %487 = vsyncpa [#allocation4], 1 }
  0xe6   :  { %488 = vsyncpa [#allocation7], 1 }
  0xe7   :  { %489 = vsyncpa [#allocation10], 1 }
  0xe8   :  { %490 = vsyncpa [#allocation5], 1 }

</bundles_post_ra>
